<compile_context>
chip_gen: v6e
topology: v6e:2x2x1
jax: 0.10.0
libtpu: 0.0.40
codegen_flags: <defaults>
</compile_context>

<pallas_src>
import functools

import jax
import jax.numpy as jnp
from jax import lax
from jax.experimental import pallas as pl
from jax.experimental.pallas import tpu as pltpu

_LANES = 128
_MAX_BLOCK_ROWS = 1024  # (1024, 128) f32 tile = 512 KiB; multiple of 8 and 16


def _hinge_kernel(x_ref, out_ref, acc_ref, *, sign, block_rows, total_rows,
                  need_mask):
    """Accumulates sum(min(sign * x - 1, 0)) over the grid into out_ref[0,0]."""
    i = pl.program_id(0)

    @pl.when(i == 0)
    def _():
        acc_ref[...] = jnp.zeros_like(acc_ref)

    x = x_ref[...].astype(jnp.float32)
    m = jnp.minimum(sign * x - 1.0, 0.0)

    if need_mask:
        # Last block may extend past the end of the array; out-of-bounds rows
        # contain unspecified data -> zero them out.
        row_ids = i * block_rows + lax.broadcasted_iota(jnp.int32, m.shape, 0)
        m = jnp.where(row_ids < total_rows, m, 0.0)

    # Element-wise (VPU-only) accumulation; no per-step cross-lane reduce.
    acc_ref[...] += m

    @pl.when(i == pl.num_programs(0) - 1)
    def _():
        # Single cross-lane/cross-sublane reduction at the very end.
        out_ref[...] = jnp.sum(acc_ref[...], keepdims=True)


def _main_sum_pallas(x2d, sign, rows):
    """Sum of min(sign*x - 1, 0) over a [rows, 128] slab via Pallas."""
    block_rows = _MAX_BLOCK_ROWS if rows >= _MAX_BLOCK_ROWS else rows
    grid = (pl.cdiv(rows, block_rows),)
    need_mask = (rows % block_rows) != 0

    kernel = functools.partial(
        _hinge_kernel,
        sign=float(sign),          # static Python scalars -> no captured consts
        block_rows=int(block_rows),
        total_rows=int(rows),
        need_mask=bool(need_mask),
    )

    out = pl.pallas_call(
        kernel,
        out_shape=jax.ShapeDtypeStruct((1, 1), jnp.float32),
        grid_spec=pltpu.PrefetchScalarGridSpec(
            num_scalar_prefetch=0,
            grid=grid,
            in_specs=[pl.BlockSpec((block_rows, _LANES), lambda i: (i, 0))],
            out_specs=pl.BlockSpec((1, 1), lambda i: (0, 0)),
            scratch_shapes=[pltpu.VMEM((block_rows, _LANES), jnp.float32)],
        ),
        compiler_params=pltpu.CompilerParams(
            dimension_semantics=("arbitrary",),
        ),
    )(x2d)
    return out[0, 0]


def hinge_loss(pred, is_target_real: bool):
    """Pallas TPU hinge GAN loss. `is_target_real` is a static Python bool."""
    sign = 1.0 if is_target_real else -1.0
    n = pred.size

    flat = pred.reshape(-1)            # native dtype; no cast, no pad
    rows = n // _LANES
    main_n = rows * _LANES
    rem = n - main_n

    # Remainder (< 128 elements) reduced in plain JAX — negligible cost.
    if rem:
        tail = flat[main_n:].astype(jnp.float32)
        tail_sum = jnp.sum(jnp.minimum(sign * tail - 1.0, 0.0))
        main = flat[:main_n]
    else:
        tail_sum = jnp.float32(0.0)
        main = flat

    if rows == 0:
        total = tail_sum
    else:
        x2d = main.reshape(rows, _LANES)
        total = _main_sum_pallas(x2d, sign, rows) + tail_sum

    return -total / n


def _reference(pred, is_target_real):
    pred = pred.astype(jnp.float32)
    if is_target_real:
        return -jnp.mean(jnp.minimum(pred - 1.0, 0.0))
    return -jnp.mean(jnp.minimum(-pred - 1.0, 0.0))


if __name__ == "__main__":
    key = jax.random.PRNGKey(0)

    test_shapes = [
        (2, 4, 16, 16),   # primary: n = 2048 (single-block path)
        (4, 8, 64, 72),   # n = 147456 -> multi-block + ragged last block
        (2, 3, 17, 19),   # n = 1938 -> non-multiple-of-128 tail path
    ]

    ok = True
    for idx, shape in enumerate(test_shapes):
        k = jax.random.fold_in(key, idx)
        pred = jax.random.normal(k, shape, dtype=jnp.float32)

        loss_real = jax.block_until_ready(hinge_loss(pred, True))
        loss_fake = jax.block_until_ready(hinge_loss(pred, False))

        ref_real = _reference(pred, True)
        ref_fake = _reference(pred, False)

        if not jnp.allclose(loss_real, ref_real, rtol=1e-5, atol=1e-5):
            ok = False
            print("MISMATCH real", shape, loss_real, ref_real)
        if not jnp.allclose(loss_fake, ref_fake, rtol=1e-5, atol=1e-5):
            ok = False
            print("MISMATCH fake", shape, loss_fake, ref_fake)

    assert ok
    print("KERNEL_OK")
</pallas_src>

<mosaic_0001>
module attributes {stable_mosaic.version = 11 : i64} {
  func.func @_hinge_kernel(%arg0: i32, %arg1: memref<16x128xf32, #tpu.memory_space<vmem>>, %arg2: memref<1x1xf32, #tpu.memory_space<vmem>>, %arg3: memref<16x128xf32, #tpu.memory_space<vmem>>) attributes {dimension_semantics = [#tpu.dimension_semantics<arbitrary>], iteration_bounds = array<i64: 1>, scalar_prefetch = 0 : i64, scratch_operands = 1 : i64, tpu.core_type = #tpu.core_type<tc>, window_params = [{transform_indices = @transform_0, window_bounds = array<i64: 16, 128>}, {pipeline_mode = #tpu.pipeline_mode<synchronous>, transform_indices = @transform_1, window_bounds = array<i64: 1, 1>}]} {
    %c0_i32 = arith.constant 0 : i32
    %0 = arith.cmpi eq, %arg0, %c0_i32 : i32
    %1 = arith.extui %0 : i1 to i32
    %c0_i32_0 = arith.constant 0 : i32
    %2 = arith.cmpi ne, %1, %c0_i32_0 : i32
    scf.if %2 {
      %cst_10 = arith.constant 0.000000e+00 : f32
      %16 = vector.broadcast %cst_10 : f32 to vector<16x128xf32>
      %c0_11 = arith.constant 0 : index
      %c0_12 = arith.constant 0 : index
      %17 = vector.load %arg3[%c0_11, %c0_12] : memref<16x128xf32, #tpu.memory_space<vmem>>, vector<16x128xf32>
      tpu.vector_store %arg3[%c0_11, %c0_12], %16 {strides = array<i32>} : memref<16x128xf32, #tpu.memory_space<vmem>>, vector<16x128xf32>,
    } else {
    }
    %c0 = arith.constant 0 : index
    %c0_1 = arith.constant 0 : index
    %3 = vector.load %arg1[%c0, %c0_1] : memref<16x128xf32, #tpu.memory_space<vmem>>, vector<16x128xf32>
    %cst = arith.constant 1.000000e+00 : f32
    %4 = vector.broadcast %cst : f32 to vector<16x128xf32>
    %5 = arith.mulf %4, %3 : vector<16x128xf32>
    %cst_2 = arith.constant 1.000000e+00 : f32
    %6 = vector.broadcast %cst_2 : f32 to vector<16x128xf32>
    %7 = arith.subf %5, %6 : vector<16x128xf32>
    %cst_3 = arith.constant 0.000000e+00 : f32
    %8 = vector.broadcast %cst_3 : f32 to vector<16x128xf32>
    %9 = arith.minimumf %7, %8 : vector<16x128xf32>
    %c0_4 = arith.constant 0 : index
    %c0_5 = arith.constant 0 : index
    %10 = vector.load %arg3[%c0_4, %c0_5] : memref<16x128xf32, #tpu.memory_space<vmem>>, vector<16x128xf32>
    %11 = arith.addf %10, %9 : vector<16x128xf32>
    %c0_6 = arith.constant 0 : index
    %c0_7 = arith.constant 0 : index
    %12 = vector.load %arg3[%c0_6, %c0_7] : memref<16x128xf32, #tpu.memory_space<vmem>>, vector<16x128xf32>
    tpu.vector_store %arg3[%c0_6, %c0_7], %11 {strides = array<i32>} : memref<16x128xf32, #tpu.memory_space<vmem>>, vector<16x128xf32>,
    %c0_i32_8 = arith.constant 0 : i32
    %13 = arith.cmpi eq, %arg0, %c0_i32_8 : i32
    %14 = arith.extui %13 : i1 to i32
    %c0_i32_9 = arith.constant 0 : i32
    %15 = arith.cmpi ne, %14, %c0_i32_9 : i32
    scf.if %15 {
      %c0_10 = arith.constant 0 : index
      %c0_11 = arith.constant 0 : index
      %16 = vector.load %arg3[%c0_10, %c0_11] : memref<16x128xf32, #tpu.memory_space<vmem>>, vector<16x128xf32>
      %17 = vector.shape_cast %16 : vector<16x128xf32> to vector<1x16x128xf32>
      %cst_12 = arith.constant dense<0.000000e+00> : vector<1xf32>
      %18 = vector.multi_reduction <add>, %17, %cst_12 [1, 2] : vector<1x16x128xf32> to vector<1xf32>
      %19 = vector.shape_cast %18 : vector<1xf32> to vector<1x1x1xf32>
      %20 = vector.extract %19[0, 0, 0] : f32 from vector<1x1x1xf32>
      %21 = vector.broadcast %20 : f32 to vector<1x1xf32>
      %c0_13 = arith.constant 0 : index
      %c0_14 = arith.constant 0 : index
      %22 = vector.load %arg2[%c0_13, %c0_14] : memref<1x1xf32, #tpu.memory_space<vmem>>, vector<1x1xf32>
      tpu.vector_store %arg2[%c0_13, %c0_14], %21 {strides = array<i32>} : memref<1x1xf32, #tpu.memory_space<vmem>>, vector<1x1xf32>,
    } else {
    }
    return
  }
  func.func @transform_0(%arg0: i32) -> (i32, i32) {
    %c0_i32 = arith.constant 0 : i32
    %c0_i32_0 = arith.constant 0 : i32
    return %arg0, %c0_i32 : i32, i32
  }
  func.func @transform_1(%arg0: i32) -> (i32, i32) {
    %c0_i32 = arith.constant 0 : i32
    %c0_i32_0 = arith.constant 0 : i32
    %c0_i32_1 = arith.constant 0 : i32
    return %c0_i32, %c0_i32_0 : i32, i32
  }
}

</mosaic_0001>

<bundles_post_ra>
// kernel: tpu_custom_call.1
= control target key start
LH: loop header
LB: loop body
LE: loop exit
PB: predicated region body
PF: predicated region fallthrough
CT: control target
= control target key end

     0   :  { %6 = vsyncpa [#allocation4], 0  ;;  %s146_s0 = inlined_call_operand.hbm [shape: f32[16,128], index: 0, kind: input, shape index: {}]   ;;  %s147_s1 = inlined_call_operand.hbm [shape: f32[1,1], index: 1, kind: output, shape index: {}]  }
   0x1   :  { %7 = vsyncpa [#allocation5], 0  ;;  %s126_s6 = smov [#allocation3]  }
   0x2   :  { %s13_s7 = sshll.u32 %s126_s6, 4  ;;  %s14_s7 = int_to_ptr.vmem [resolvable:$true] %s13_s7 }
   0x3   :  { %s90_s8 = scalar_lea.vmem %s14_s7, 256  ;;  %p95_p1 = scmp.lt.s32.totalorder %s14_s7, %s14_s7 }
   0x4   :  { %p91_p0 = scmp.ne.s32.totalorder %s14_s7, %s90_s8  ;;  %p96_p2 = scmp.lt.s32.totalorder %s90_s8, %s90_s8 }
   0x6   :  { %p97_p3 = por %p96_p2, %p95_p1 }
   0x8   :  { %p98_p4 = pnand %p97_p3, %p91_p0 }
   0xa   :  { %101 = shalt.err (!%p98_p4)
}
   0xb   :  { %s127_s9 = smov 128   ;;  %s128_s10 = smov 8  }
   0xc   :  { %19 = dma.hbm_to_vmem [thread:$0]  %s146_s0, 256, %s14_s7, [#allocation4], %s127_s9, %s127_s9, %s128_s10  }
   0xd   :  { %122 = dma.done.wait [#allocation4], 256  }
   0xe   :  { %123 = vsyncadd [#allocation4], 4294967040  ;;  %v29_v0 = vld [vmem:[#allocation3] sm:$0xff]  ;;  %v30_v1 = vld [vmem:[#allocation3 + $0x8] sm:$0xff]  ;;  %s129_s13 = smov [#allocation6]   ;;  %vm57_vm0 = vcmask 0  }
   0xf   :  { %v74_v2 = vadd.f32 -1.0, %v29_v0  ;;  %v75_v3 = vadd.f32 -1.0, %v30_v1  ;;  %s65_s0 = sshll.u32 %s129_s13, 4  ;;  %s66_s0 = int_to_ptr.vmem [resolvable:$true] %s65_s0 }
  0x10   :  { %s102_s15 = scalar_lea.vmem %s66_s0, 16  ;;  %s106_s16 = scalar_lea.vmem %s66_s0, 32 }
  0x11   :  { %v33_v4 = vmin.f32 %v74_v2, 0.0  ;;  %v34_v5 = vmin.f32 %v75_v3, 0.0  ;;  %p103_p5 = scmp.ne.s32.totalorder %s66_s0, %s102_s15  ;;  %p107_p6 = scmp.lt.s32.totalorder %s66_s0, %s66_s0 }
  0x12   :  { %p108_p7 = scmp.lt.s32.totalorder %s106_s16, %s102_s15 }
  0x13   :  { %v46_v6 = vadd.f32 %v34_v5, %v33_v4 }
  0x14   :  { %p109_p8 = por %p108_p7, %p107_p6 }
  0x15   :  { %47 = vadd.xlane.f32.xlu0 %v46_v6 }
  0x16   :  { %p110_p9 = pnand %p109_p8, %p103_p5 }
  0x9e   :  { %v48_v7 = vpop.xlane.xlu0 %47 }
  0x9f   :  { %v49_v8 = vrot.slane %v48_v7, 4 }
  0xa1   :  { %v50_v9 = vadd.f32 %v49_v8, %v48_v7 }
  0xa3   :  { %v51_v10 = vrot.slane %v50_v9, 2 }
  0xa5   :  { %v52_v11 = vadd.f32 %v51_v10, %v50_v9 }
  0xa7   :  { %v53_v12 = vrot.slane %v52_v11, 1 }
  0xa9   :  { %v54_v13 = vadd.f32 %v53_v12, %v52_v11 }
  0xab   :  { %76 = vpush %v54_v13 }
  0xdc   :  { %s77_s14 = spop %76 }
  0xdd   :  { %v56_v14 = vstv %s77_s14 }
  0xde   :  { %58 = vst.msk [vmem:[#allocation6] sm:$0x1] %vm57_vm0, %v56_v14 }
  0xdf   :  { %113 = shalt.err (!%p110_p9)
}
  0xe0   :  { %68 = dma.vmem_to_hbm [thread:$0]  %s66_s0, 16, %s147_s1, [#allocation5]  }
  0xe1   :  { %124 = dma.done.wait [#allocation5], 16  }
  0xe2   :  { %125 = vsyncadd [#allocation5], 4294967280 }
  0xe3   :  { %72 = vsyncpa [#allocation4], 1 }
  0xe4   :  { %73 = vsyncpa [#allocation5], 1 }

</bundles_post_ra>
